<compile_context>
chip_gen: v7x
topology: tpu7x:2x2x1
jax: 0.10.0
libtpu: 0.0.40
codegen_flags: <defaults>
</compile_context>

<pallas_src>
import jax
import jax.numpy as jnp
from jax.experimental import pallas as pl
from jax.experimental.pallas import tpu as pltpu


def _adjoint_conv_kernel(x_ref, w_ref, o_ref):
    # x_ref: (Cin, ts) spatial-last input tile
    # w_ref: (Cout, Cin) transposed weight (full, tiny)
    # o_ref: (Cout, ts) spatial-last output tile (lane-dense stores)
    cin = x_ref.shape[0]
    if cin <= 16:
        # Unrolled VPU formulation: acc[co, s] += w[co, ci] * x[ci, s]
        w = w_ref[...].astype(jnp.float32)          # (Cout, Cin)
        acc = w[:, 0:1] * x_ref[0:1, :].astype(jnp.float32)
        for ci in range(1, cin):
            acc = acc + w[:, ci : ci + 1] * x_ref[ci : ci + 1, :].astype(jnp.float32)
    else:
        # Fallback for wide channel counts: single MXU matmul.
        acc = jnp.dot(w_ref[...], x_ref[...], preferred_element_type=jnp.float32)
    o_ref[...] = acc.astype(o_ref.dtype)


def _pick_spatial_tile(s, cap=4096):
    """Largest spatial tile that (a) divides S and (b) is lane-aligned or full."""
    if s <= cap:
        return s
    for t in range((cap // 128) * 128, 0, -128):
        if s % t == 0:
            return t
    return s  # no aligned divisor: fall back to one full-row block


def adjoint_out_conv_forward(x_nchw, weight, *, max_tile=4096):
    """x_nchw: (N, Cin, H, W); weight: (Cin, Cout, 1, 1) as in nn.ConvTranspose2d."""
    N, Cin, H, W = x_nchw.shape
    Cout = weight.shape[1]
    S = H * W

    # Free reshapes only (no data movement): NCHW -> (N, Cin, S); weight -> (Cout, Cin).
    x3 = x_nchw.reshape(N, Cin, S)
    w_t = weight.reshape(Cin, Cout).T  # (Cout, Cin), 32 elements

    ts = _pick_spatial_tile(S, max_tile)
    grid = (N, S // ts)

    itemsize = jnp.dtype(x_nchw.dtype).itemsize
    in_block = Cin * ts * itemsize
    out_block = Cout * ts * itemsize
    w_bytes = Cin * Cout * itemsize
    vmem_needed = 2 * (in_block + out_block) + w_bytes  # double-buffered blocks
    vmem_limit = int(min(32 * 1024 * 1024, max(4 * 1024 * 1024, 4 * vmem_needed)))

    cost = pl.CostEstimate(
        flops=2 * N * S * Cin * Cout,
        transcendentals=0,
        bytes_accessed=itemsize * (N * Cin * S + Cin * Cout + N * Cout * S),
    )

    y3 = pl.pallas_call(
        _adjoint_conv_kernel,
        out_shape=jax.ShapeDtypeStruct((N, Cout, S), x_nchw.dtype),
        grid_spec=pltpu.PrefetchScalarGridSpec(
            num_scalar_prefetch=0,
            grid=grid,
            in_specs=[
                # (N, Cin, S): squeeze batch, full Cin, spatial tile (lane-dense).
                pl.BlockSpec((None, Cin, ts), lambda n, s: (n, 0, s)),
                # Full (Cout, Cin) weight every step (128 bytes).
                pl.BlockSpec((Cout, Cin), lambda n, s: (0, 0)),
            ],
            out_specs=pl.BlockSpec((None, Cout, ts), lambda n, s: (n, 0, s)),
        ),
        compiler_params=pltpu.CompilerParams(
            dimension_semantics=("parallel", "parallel"),
            vmem_limit_bytes=vmem_limit,
        ),
        cost_estimate=cost,
    )(x3, w_t)

    # (N, Cout, S) -> (N, Cout, H, W): pure reshape, no transpose.
    return y3.reshape(N, Cout, H, W)


if __name__ == "__main__":
    key = jax.random.PRNGKey(0)
    kx, kw = jax.random.split(key)

    # Original out_conv: Conv2d(in_channels=8, out_channels=4, kernel_size=1)
    # Adjoint: ConvTranspose2d(in_channels=4, out_channels=8, kernel_size=1, bias=False)
    #   -> weight shape (Cin=4, Cout=8, 1, 1), shared with the original conv weight.
    N, Cin, Cout, H, W = 2, 4, 8, 16, 16

    x = jax.random.normal(kx, (N, Cin, H, W), dtype=jnp.float32)
    weight = jax.random.normal(kw, (Cin, Cout, 1, 1), dtype=jnp.float32)

    y = adjoint_out_conv_forward(x, weight)
    y = jax.block_until_ready(y)

    # Reference (plain JAX) for ConvTranspose2d(k=1, no bias) semantics.
    y_ref = jnp.einsum("nchw,cd->ndhw", x, weight.reshape(Cin, Cout))

    assert y.shape == (N, Cout, H, W), y.shape
    assert jnp.allclose(y, y_ref, atol=1e-5, rtol=1e-5)
    print("KERNEL_OK")
</pallas_src>

<mosaic_0001>
module attributes {stable_mosaic.version = 11 : i64} {
  func.func @_adjoint_conv_kernel(%arg0: i32, %arg1: i32, %arg2: memref<1x4x256xf32, #tpu.memory_space<vmem>>, %arg3: memref<8x4xf32, #tpu.memory_space<vmem>>, %arg4: memref<1x8x256xf32, #tpu.memory_space<vmem>>) attributes {dimension_semantics = [#tpu.dimension_semantics<parallel>, #tpu.dimension_semantics<parallel>], iteration_bounds = array<i64: 2, 1>, scalar_prefetch = 0 : i64, scratch_operands = 0 : i64, tpu.core_type = #tpu.core_type<tc>, window_params = [{transform_indices = @transform_0, window_bounds = array<i64: 1, 4, 256>}, {pipeline_mode = #tpu.pipeline_mode<synchronous>, transform_indices = @transform_1, window_bounds = array<i64: 8, 4>}, {transform_indices = @transform_2, window_bounds = array<i64: 1, 8, 256>}]} {
    %c0 = arith.constant 0 : index
    %c0_0 = arith.constant 0 : index
    %0 = vector.load %arg3[%c0, %c0_0] : memref<8x4xf32, #tpu.memory_space<vmem>>, vector<8x4xf32>
    %1 = vector.extract_strided_slice %0 {offsets = [0, 0], sizes = [8, 1], strides = [1, 1]} : vector<8x4xf32> to vector<8x1xf32>
    %c0_1 = arith.constant 0 : index
    %c0_2 = arith.constant 0 : index
    %c0_3 = arith.constant 0 : index
    %2 = vector.load %arg2[%c0_1, %c0_2, %c0_3] : memref<1x4x256xf32, #tpu.memory_space<vmem>>, vector<1x1x256xf32>
    %3 = vector.shape_cast %2 : vector<1x1x256xf32> to vector<1x256xf32>
    %4 = vector.broadcast %1 : vector<8x1xf32> to vector<8x256xf32>
    %5 = vector.broadcast %3 : vector<1x256xf32> to vector<8x256xf32>
    %6 = arith.mulf %4, %5 : vector<8x256xf32>
    %7 = vector.extract_strided_slice %0 {offsets = [0, 1], sizes = [8, 1], strides = [1, 1]} : vector<8x4xf32> to vector<8x1xf32>
    %c0_4 = arith.constant 0 : index
    %c1 = arith.constant 1 : index
    %c0_5 = arith.constant 0 : index
    %8 = vector.load %arg2[%c0_4, %c1, %c0_5] : memref<1x4x256xf32, #tpu.memory_space<vmem>>, vector<1x1x256xf32>
    %9 = vector.shape_cast %8 : vector<1x1x256xf32> to vector<1x256xf32>
    %10 = vector.broadcast %7 : vector<8x1xf32> to vector<8x256xf32>
    %11 = vector.broadcast %9 : vector<1x256xf32> to vector<8x256xf32>
    %12 = arith.mulf %10, %11 : vector<8x256xf32>
    %13 = arith.addf %6, %12 : vector<8x256xf32>
    %14 = vector.extract_strided_slice %0 {offsets = [0, 2], sizes = [8, 1], strides = [1, 1]} : vector<8x4xf32> to vector<8x1xf32>
    %c0_6 = arith.constant 0 : index
    %c2 = arith.constant 2 : index
    %c0_7 = arith.constant 0 : index
    %15 = vector.load %arg2[%c0_6, %c2, %c0_7] : memref<1x4x256xf32, #tpu.memory_space<vmem>>, vector<1x1x256xf32>
    %16 = vector.shape_cast %15 : vector<1x1x256xf32> to vector<1x256xf32>
    %17 = vector.broadcast %14 : vector<8x1xf32> to vector<8x256xf32>
    %18 = vector.broadcast %16 : vector<1x256xf32> to vector<8x256xf32>
    %19 = arith.mulf %17, %18 : vector<8x256xf32>
    %20 = arith.addf %13, %19 : vector<8x256xf32>
    %21 = vector.extract_strided_slice %0 {offsets = [0, 3], sizes = [8, 1], strides = [1, 1]} : vector<8x4xf32> to vector<8x1xf32>
    %c0_8 = arith.constant 0 : index
    %c3 = arith.constant 3 : index
    %c0_9 = arith.constant 0 : index
    %22 = vector.load %arg2[%c0_8, %c3, %c0_9] : memref<1x4x256xf32, #tpu.memory_space<vmem>>, vector<1x1x256xf32>
    %23 = vector.shape_cast %22 : vector<1x1x256xf32> to vector<1x256xf32>
    %24 = vector.broadcast %21 : vector<8x1xf32> to vector<8x256xf32>
    %25 = vector.broadcast %23 : vector<1x256xf32> to vector<8x256xf32>
    %26 = arith.mulf %24, %25 : vector<8x256xf32>
    %27 = arith.addf %20, %26 : vector<8x256xf32>
    %c0_10 = arith.constant 0 : index
    %c0_11 = arith.constant 0 : index
    %c0_12 = arith.constant 0 : index
    %28 = vector.load %arg4[%c0_10, %c0_11, %c0_12] : memref<1x8x256xf32, #tpu.memory_space<vmem>>, vector<1x8x256xf32>
    %29 = vector.shape_cast %28 : vector<1x8x256xf32> to vector<8x256xf32>
    %30 = vector.shape_cast %27 : vector<8x256xf32> to vector<1x8x256xf32>
    tpu.vector_store %arg4[%c0_10, %c0_11, %c0_12], %30 {strides = array<i32>} : memref<1x8x256xf32, #tpu.memory_space<vmem>>, vector<1x8x256xf32>,
    return
  }
  func.func @transform_0(%arg0: i32, %arg1: i32) -> (i32, i32, i32) {
    %c0_i32 = arith.constant 0 : i32
    %c0_i32_0 = arith.constant 0 : i32
    return %arg0, %c0_i32, %arg1 : i32, i32, i32
  }
  func.func @transform_1(%arg0: i32, %arg1: i32) -> (i32, i32) {
    %c0_i32 = arith.constant 0 : i32
    %c0_i32_0 = arith.constant 0 : i32
    %c0_i32_1 = arith.constant 0 : i32
    return %c0_i32, %c0_i32_0 : i32, i32
  }
  func.func @transform_2(%arg0: i32, %arg1: i32) -> (i32, i32, i32) {
    %c0_i32 = arith.constant 0 : i32
    %c0_i32_0 = arith.constant 0 : i32
    return %arg0, %c0_i32, %arg1 : i32, i32, i32
  }
}

</mosaic_0001>

<bundles_post_ra>
// kernel: tpu_custom_call.1
= control target key start
LH: loop header
LB: loop body
LE: loop exit
PB: predicated region body
PF: predicated region fallthrough
CT: control target
= control target key end

     0   :  { %7 = vsyncpa [#allocation3], 0  ;;  %s768_s0 = inlined_call_operand.hbm [shape: f32[2,4,256], index: 0, kind: input, shape index: {}]   ;;  %s769_s1 = inlined_call_operand.vmem [shape: f32[8,4], index: 1, kind: input, shape index: {}]   ;;  %s770_s2 = inlined_call_operand.hbm [shape: f32[2,8,256], index: 2, kind: output, shape index: {}]  }
   0x1   :  { %9 = vsyncpa [#allocation3 + $0x1], 0 }
   0x2   :  { %10 = vsyncpa [#allocation4], 0 }
   0x3   :  { %12 = vsyncpa [#allocation4 + $0x1], 0  ;;  %s592_s9 = smov 0   ;;  %s594_s10 = smov 0  }
   0x4   :  { %s596_s11 = smov 0   ;;  %s598_s12 = smov 0  }
   0x5   :  { %s600_s13 = smov 0   ;;  %s602_s14 = smov 0  }
   0x6 LB: > { %s366_s15 = sadd.s32 4294967295, %s569_s14   ;;  %s367_s16 = sadd.s32 4294967294, %s569_s14   ;;  %s569_s14 = sphi %s602_s14, %s18_s14   ;;  %s565_s13 = sphi %s600_s13, %s786_s13   ;;  %s561_s12 = sphi %s598_s12, %s785_s12   ;;  %s557_s11 = sphi %s596_s11, %s784_s11   ;;  %s553_s10 = sphi %s594_s10, %s783_s10   ;;  %s549_s9 = sphi %s592_s9, %s782_s9  }
   0x7   : > { %s30_s17 = sadd.s32 1, %s565_s13  ;;  %s39_s18 = sadd.s32 1, %s557_s11 }
   0x8   : > { %p32_p0 = scmp.ge.s32.totalorder %s30_s17, 2  ;;  %p46_p1 = scmp.ne.s32.totalorder %s557_s11, %s553_s10 }
   0x9   : > { %p47_p2 = scmp.eq.s32.totalorder %s569_s14, 0  ;;  %p52_p3 = scmp.ne.s32.totalorder %s553_s10, %s549_s9 }
   0xa   : > { %s788_s17 = smov (%p32_p0, %s30_s17), 0  ;;  %p53_p5 = scmp.eq.s32.totalorder %s366_s15, 0 }
   0xb   : > { %p633_p4 = por %p47_p2, %p46_p1  ;;  %s34_s20 = ssub.s32 %s565_s13, %s788_s17 }
   0xc   : > { %p99_p6 = scmp.eq.s32.totalorder %s366_s15, 1  ;;  %p37_p7 = scmp.eq.s32.totalorder %s34_s20, 0 }
   0xd   : > { %p639_p8 = por %p53_p5, %p52_p3  ;;  %p105_p10 = scmp.eq.s32.totalorder %s367_s16, 1 }
   0xe   : > { %p643_p9 = por %p99_p6, %p46_p1  ;;  %p398_p13 = scmp.lt.s32.totalorder %s569_s14, 2 }
   0xf   : > { %s648_s23 = scalar_select %p37_p7, %s557_s11, %s39_s18  }
  0x10   : > { %s774_s22 = scalar_select %p643_p9, 1, 0 }
  0x11   : > { %p650_p11 = por %p105_p10, %p52_p3  ;;  %s128_s25 = sand.u32 1, %s557_s11  }
  0x12   : > { %s370_s26 = sshll.u32 %s128_s25, 3  ;;  %s384_s27 = sshll.u32 %s565_s13, 7 }
  0x13   : > { %s775_s24 = scalar_select %p650_p11, 1, 0 }
  0x14   : > { %s661_s30 = scalar_lea.hbm %s768_s0, %s384_s27  ;;  %s132_s3 = scalar_lea.vmem [#allocation2], %s370_s26 }
  0x15   : > { %s142_s4 = sshll.u32 %s132_s3, 4  ;;  %p667_p0 = pnand %p398_p13, %p633_p4  ;;  %s663_s4 = int_to_ptr.vmem [resolvable:$true] %s142_s4 }
  0x16   : > { %s129_s6 = scalar_lea.sflag [#allocation3], %s128_s25  ;;  %s457_s7 = scalar_lea.hbm %s661_s30, 128 }
  0x17   : > { %p458_p3 = scmp.ne.s32.totalorder %s661_s30, %s457_s7  ;;  %p459_p5 = pneg %p667_p0 }
  0x18   : > { %s462_s16 = scalar_lea.hbm %s768_s0, 256  ;;  %p463_p4 = scmp.lt.u32.totalorder %s661_s30, %s768_s0 }
  0x19   : > { %p460_p6 = pnand %p459_p5, %p458_p3  ;;  %p464_p10 = scmp.lt.u32.totalorder %s462_s16, %s457_s7 }
  0x1a   : > { %p466_p12 = scmp.lt.u32.totalorder %s457_s7, %s661_s30 }
  0x1b   : > { %p461_p7 = pneg %p460_p6  ;;  %p465_p13 = por %p464_p10, %p463_p4 }
  0x1d   : > { %p467_p1 = por %p466_p12, %p465_p13 }
  0x1f   : > { %p468_p2 = pnand %p467_p1, %p461_p7 }
  0x21   : > { %471 = shalt.err (!%p468_p2)
}
  0x22   : > { %s472_s20 = scalar_lea.vmem %s663_s4, 128  ;;  %s571_s25 = smov [#allocation2]  }
  0x23   : > { %p473_p3 = scmp.ne.s32.totalorder %s663_s4, %s472_s20  ;;  %s477_s26 = sshll.u32 %s571_s25, 4  ;;  %s478_s26 = int_to_ptr.vmem [resolvable:$false] %s477_s26 }
  0x24   : > { %s479_s27 = scalar_lea.vmem %s478_s26, 256  ;;  %p480_p9 = scmp.lt.s32.totalorder %s663_s4, %s478_s26 }
  0x25   : > { %p475_p6 = pnand %p473_p3, %p459_p5  ;;  %p481_p4 = scmp.lt.s32.totalorder %s479_s27, %s472_s20 }
  0x27   : > { %p476_p11 = pneg %p475_p6  ;;  %p482_p10 = por %p481_p4, %p480_p9 }
  0x29   : > { %p483_p12 = pnand %p482_p10, %p476_p11 }
  0x2b   : > { %486 = shalt.err (!%p483_p12)
}
  0x2c   : > { %393 = dma.hbm_to_vmem [thread:$0]  (!%p667_p0), %s661_s30, 128, %s663_s4, %s129_s6  }
  0x2d   : > { %p777_p1 = scmp.lt.s32.totalorder %s569_s14, 3  ;;  %p778_p2 = scmp.ge.s32.totalorder %s569_s14, 1 }
  0x2f   : > { %p148_p5 = pnand %p778_p2, %p777_p1 }
  0x30   : > { %s703_s28 = sand.u32 (!%p148_p5), 1, %s553_s10  }
  0x31   : > { %151 = sbr.rel (%p148_p5) target bundleno = 214 (0xd6), region = 28  ;;  %s374_s29 = sshll.u32 (!%p148_p5), %s703_s28, 3 }
  0x32   : > { %s154_s3 = scalar_lea.sflag (!%p148_p5), [#allocation3], %s703_s28  ;;  %s157_s7 = scalar_lea.vmem (!%p148_p5), [#allocation2], %s374_s29 }
  0x38   : > { %540 = dma.done.wait (%p639_p8), %s154_s3, 128  }
  0x39   : > { %542 = vsyncadd (%p639_p8), %s154_s3, 4294967168  ;;  %v572_v0 = vmov 0   ;;  %v573_v1 = vmov 2   ;;  %v180_v2 = vld [vmem:[%s769_s1] sm:$0xff]  ;;  %v574_v3 = vmov 1   ;;  %v575_v4 = vmov 3  }
  0x3a   : > { %452 = vset.pattern.permute.xlu0 %v572_v0  ;;  %454 = vset.pattern.permute.xlu1 %v573_v1  ;;  %v188_v5 = vlaneseq  ;;  %v181_v9 = vld [vmem:[%s157_s7] ss:$4 sm:$0x3]  ;;  %v376_v10 = vld [vmem:[%s157_s7 + $0x1] ss:$4 sm:$0x3] }
  0x3b   : > { %184 = vperm.xlu0 %452, %v180_v2   ;;  %224 = vperm.xlu1 %454, %v180_v2   ;;  %v377_v12 = vld [vmem:[%s157_s7 + $0x2] ss:$4 sm:$0x3]  ;;  %v378_v14 = vld [vmem:[%s157_s7 + $0x3] ss:$4 sm:$0x3] }
  0x3c   : > { %v189_v6 = vshrl.u32 %v188_v5, 7  ;;  %s375_s21 = sshll.u32 %s703_s28, 4  ;;  %s385_s5 = sshll.u32 %s561_s12, 8 }
  0x3d   : > { %s177_s6 = scalar_lea.vmem [#allocation5], %s375_s21  ;;  %s719_s18 = scalar_lea.hbm %s770_s2, %s385_s5 }
  0x3e   : > { %v190_v7 = vsub.s32 0, %v189_v6  ;;  %v194_v8 = vsub.s32 1, %v189_v6  ;;  %s282_s8 = sshll.u32 %s177_s6, 4  ;;  %s266_s19 = scalar_lea.sflag [#allocation4], %s703_s28  ;;  %s721_s8 = int_to_ptr.vmem [resolvable:$true] %s282_s8 }
  0x3f   : > { %453 = vset.pattern.permute.xlu0 %v574_v3  ;;  %455 = vset.pattern.permute.xlu1 %v575_v4  ;;  %s487_s12 = scalar_lea.vmem %s721_s8, 256  ;;  %p779_p9 = scmp.ne.s32.totalorder %s774_s22, 0 }
  0x40   : > { %203 = vperm.xlu0 %453, %v180_v2   ;;  %245 = vperm.xlu1 %455, %v180_v2   ;;  %v191_v15 = vrot.slane %v181_v9, %v190_v7  ;;  %v195_v16 = vrot.slane %v181_v9, %v194_v8  ;;  %v210_v17 = vrot.slane %v376_v10, %v190_v7  ;;  %p488_p8 = scmp.ne.s32.totalorder %s721_s8, %s487_s12  ;;  %s576_s20 = smov [#allocation5]  }
  0x41   : > { %v214_v18 = vrot.slane %v376_v10, %v194_v8  ;;  %v231_v19 = vrot.slane %v377_v12, %v190_v7  ;;  %v235_v20 = vrot.slane %v377_v12, %v194_v8  ;;  %v252_v21 = vrot.slane %v378_v14, %v190_v7  ;;  %s491_s25 = sshll.u32 %s576_s20, 4  ;;  %s492_s25 = int_to_ptr.vmem [resolvable:$false] %s491_s25 }
  0x42   : > { %v256_v22 = vrot.slane %v378_v14, %v194_v8  ;;  %p489_p11 = pnand %p488_p8, %p779_p9  ;;  %s493_s26 = scalar_lea.vmem %s492_s25, 512 }
  0x43   : > { %p494_p7 = scmp.lt.s32.totalorder %s721_s8, %s492_s25  ;;  %p495_p13 = scmp.lt.s32.totalorder %s493_s26, %s487_s12 }
  0x44   : > { %456 = vset.pattern.permute.xlu0 %v575_v4  ;;  %p490_p0 = pneg %p489_p11 }
  0x45   : > { %p496_p3 = por %p495_p13, %p494_p7 }
  0x47   : > { %p497_p6 = pnand %p496_p3, %p490_p0 }
  0xba   : > { %v185_v11 = vpop.permute.xlu0 %184  ;;  %v225_v13 = vpop.permute.xlu1 %224 }
  0xbb   : > { %v198_v25 = vmul.f32 %v191_v15, %v185_v11  ;;  %v199_v26 = vmul.f32 %v195_v16, %v185_v11  ;;  %v238_v29 = vmul.f32 %v231_v19, %v225_v13  ;;  %v239_v30 = vmul.f32 %v235_v20, %v225_v13 }
  0xbf   : > { %v204_v23 = vpop.permute.xlu0 %203  ;;  %v246_v24 = vpop.permute.xlu1 %245 }
  0xc0   : > { %v217_v27 = vmul.f32 %v210_v17, %v204_v23  ;;  %v218_v28 = vmul.f32 %v214_v18, %v204_v23  ;;  %v259_v33 = vmul.f32 %v252_v21, %v246_v24  ;;  %v260_v34 = vmul.f32 %v256_v22, %v246_v24 }
  0xc2   : > { %v219_v31 = vadd.f32 %v217_v27, %v198_v25  ;;  %v220_v32 = vadd.f32 %v218_v28, %v199_v26 }
  0xc4   : > { %v240_v35 = vadd.f32 %v238_v29, %v219_v31  ;;  %v241_v36 = vadd.f32 %v239_v30, %v220_v32 }
  0xc6   : > { %v261_v37 = vadd.f32 %v259_v33, %v240_v35  ;;  %v262_v38 = vadd.f32 %v260_v34, %v241_v36 }
  0xc8   : > { %263 = vst [vmem:[%s177_s6] sm:$0xff] %v261_v37  ;;  %264 = vst [vmem:[%s177_s6 + $0x8] sm:$0xff] %v262_v38 }
  0xc9   : > { %500 = shalt.err (!%p497_p6)
}
  0xca   : > { %s501_s27 = scalar_lea.hbm %s719_s18, 256  ;;  %s505_s3 = scalar_lea.hbm %s770_s2, 512 }
  0xcb   : > { %p502_p4 = scmp.ne.s32.totalorder %s719_s18, %s501_s27  ;;  %p506_p1 = scmp.lt.u32.totalorder %s719_s18, %s770_s2 }
  0xcc   : > { %p507_p2 = scmp.lt.u32.totalorder %s505_s3, %s501_s27  ;;  %p509_p8 = scmp.lt.u32.totalorder %s501_s27, %s719_s18 }
  0xcd   : > { %p503_p10 = pnand %p502_p4, %p779_p9 }
  0xce   : > { %p508_p5 = por %p507_p2, %p506_p1 }
  0xcf   : > { %p504_p12 = pneg %p503_p10 }
  0xd0   : > { %p510_p11 = por %p509_p8, %p508_p5 }
  0xd2   : > { %p511_p0 = pnand %p510_p11, %p504_p12 }
  0xd4   : > { %514 = shalt.err (!%p511_p0)
}
  0xd5   : > { %388 = dma.vmem_to_hbm [thread:$0]  (%p779_p9), %s721_s8, 256, %s719_s18, %s266_s19  }
  0xd6 PF: > { %s294_s4 = sand.u32 1, %s549_s9   ;;  %p780_p7 = scmp.ne.s32.totalorder %s775_s24, 0 }
  0xd7   : > { %p781_p13 = scmp.ge.s32.totalorder %s569_s14, 2  ;;  %s295_s21 = scalar_lea.sflag [#allocation4], %s294_s4 }
  0xd9   : > { %p395_p3 = pnand %p781_p13, %p780_p7 }
  0xdb   : > { %544 = dma.done.wait (!%p395_p3), %s295_s21, 256  }
  0xdc   : > { %546 = vsyncadd (!%p395_p3), %s295_s21, 4294967040  ;;  %s18_s14 = sadd.s32 1, %s569_s14   ;;  %s782_s9 = smov %s553_s10 }
  0xdd   : > { %p15_p6 = scmp.ge.s32.totalorder %s18_s14, 4   ;;  %s783_s10 = smov %s557_s11 }
  0xde   : > { %s784_s11 = smov %s648_s23  ;;  %s785_s12 = smov %s565_s13 }
  0xdf   : > { %s786_s13 = smov %s788_s17  ;;  %17 = sbr.rel (!%p15_p6) target bundleno = 6 (0x6), region = 76 }
  0xe6   :  { %300 = vsyncpa [#allocation3], 1 }
  0xe7   :  { %302 = vsyncpa [#allocation3 + $0x1], 1 }
  0xe8   :  { %303 = vsyncpa [#allocation4], 1 }
  0xe9   :  { %305 = vsyncpa [#allocation4 + $0x1], 1 }

</bundles_post_ra>
